<compile_context>
chip_gen: v7x
topology: tpu7x:2x2x1
jax: 0.10.0
libtpu: 0.0.40
codegen_flags: <defaults>
</compile_context>

<pallas_src>
import jax
import jax.numpy as jnp
from jax.experimental import pallas as pl
from jax.experimental.pallas import tpu as pltpu

_EPS = 1e-5


def _make_kernel(has_bias, two_pass):
    def kernel(x_ref, w_ref, *refs):
        if has_bias:
            b_ref, o_ref = refs
        else:
            (o_ref,) = refs
        x = x_ref[...].astype(jnp.float32)
        if two_pass:
            # Fallback: numerically safest when |mean| >> std.
            mean = jnp.mean(x, axis=-1, keepdims=True)
            xc = x - mean
            var = jnp.mean(xc * xc, axis=-1, keepdims=True)   # biased (1/N)
        else:
            # One-pass moments: only `x` stays live across the two reductions.
            mean = jnp.mean(x, axis=-1, keepdims=True)
            var = jnp.maximum(
                jnp.mean(x * x, axis=-1, keepdims=True) - mean * mean, 0.0)
            xc = x - mean
        inv = jax.lax.rsqrt(var + _EPS)
        y = xc * inv * w_ref[...]
        if has_bias:
            y = y + b_ref[...]
        o_ref[...] = y.astype(o_ref.dtype)
    return kernel


def _vmem_capacity_bytes():
    """Per-core VMEM capacity, with a conservative (v7x-sized) fallback."""
    try:
        info = pltpu.get_tpu_info()
        cap = getattr(info, "vmem_capacity_bytes", None)
        if cap:
            return int(cap)
    except Exception:
        pass
    return 64 << 20  # v7x per-TC VMEM; safe lower bound for all generations


def _choose_tile_rows(rows, C, dtype, vmem_limit_bytes):
    """Pick a row-tile size: ~4 MiB input blocks, >= 8 grid steps when rows
    allow, even step counts for v7x's two TensorCores, and a VMEM footprint
    (double-buffered I/O in the real dtype + f32 internals, lane-padded)
    that fits under `vmem_limit_bytes` on all generations."""
    itemsize = jnp.dtype(dtype).itemsize
    mult = 8 if itemsize >= 4 else (16 if itemsize == 2 else 32)
    c_pad = pl.cdiv(C, 128) * 128  # VMEM tiles are padded to 128 lanes

    # Per-row VMEM bytes: 2x-buffered input + 2x-buffered output in the I/O
    # dtype, plus ~2 blocks worth of f32 internals (x cast + temporaries).
    per_row = c_pad * (4 * itemsize + 2 * 4)
    footprint_budget = max(4 << 20, vmem_limit_bytes - (8 << 20))
    max_rows_vmem = max(mult, (footprint_budget // per_row) // mult * mult)

    # ~4 MiB of HBM traffic per input block: amortizes the ~0.35 us/step
    # overhead while keeping plenty of pipeline stages on realistic shapes.
    target_block_io = 4 << 20
    max_rows_io = max(mult, (target_block_io // max(1, C * itemsize)) // mult * mult)

    rows_up = pl.cdiv(rows, mult) * mult
    tile = min(max_rows_vmem, max_rows_io, rows_up)

    # Keep >= 8 grid steps when the problem is big enough, so prologue /
    # epilogue DMAs stay hidden and each v7x TensorCore gets >= 4 steps.
    min_steps = 8
    if rows_up >= min_steps * mult:
        tile = min(tile, max(mult, (pl.cdiv(rows, min_steps) // mult) * mult))

    # Prefer an even step count so the parallel 1-D grid splits evenly across
    # v7x's two TensorCores (harmless on single-core chips).
    n = pl.cdiv(rows, tile)
    if n > 1 and n % 2 == 1:
        t = tile
        while t > mult:
            t -= mult
            if pl.cdiv(rows, t) % 2 == 0:
                tile = t
                break

    # Single block: make it exactly the row count (no masked rows needed).
    if pl.cdiv(rows, tile) <= 1:
        tile = rows
    return max(1, tile)


def layer_norm(x, weight, bias=None, *, tile_rows=None, two_pass=False):
    """LayerNorm over the last dim of x. x: (..., C); weight: (C,); bias: (C,) or None."""
    orig_shape = x.shape
    C = orig_shape[-1]
    rows = 1
    for d in orig_shape[:-1]:
        rows *= d
    x2 = x.reshape(rows, C)

    # Generation-aware scoped-VMEM limit: 64 MiB on 128 MiB chips (v5e/v6e,
    # well above v5e's 16 MiB scoped default), ~48 MiB on v7x's 64 MiB VMEM.
    vmem_cap = _vmem_capacity_bytes()
    vmem_limit = int(min(64 << 20, max(32 << 20, vmem_cap - (16 << 20))))

    if tile_rows is None:
        tile_rows = _choose_tile_rows(rows, C, x.dtype, vmem_limit)
    n_tiles = pl.cdiv(rows, tile_rows)

    # Params: pre-cast to f32 once (C elements), shaped (1, C) for lane broadcast.
    w2 = weight.reshape(1, C).astype(jnp.float32)

    x_spec = pl.BlockSpec((tile_rows, C), lambda i: (i, 0))
    p_spec = pl.BlockSpec((1, C), lambda i: (0, 0))
    out_spec = pl.BlockSpec((tile_rows, C), lambda i: (i, 0))

    if bias is not None:
        b2 = bias.reshape(1, C).astype(jnp.float32)
        kernel = _make_kernel(has_bias=True, two_pass=two_pass)
        in_specs = [x_spec, p_spec, p_spec]
        args = (x2, w2, b2)
    else:
        kernel = _make_kernel(has_bias=False, two_pass=two_pass)
        in_specs = [x_spec, p_spec]
        args = (x2, w2)

    out = pl.pallas_call(
        kernel,
        out_shape=jax.ShapeDtypeStruct((rows, C), x.dtype),
        grid_spec=pltpu.PrefetchScalarGridSpec(
            num_scalar_prefetch=0,
            grid=(n_tiles,),
            in_specs=in_specs,
            out_specs=out_spec,
        ),
        compiler_params=pltpu.CompilerParams(
            dimension_semantics=("parallel",),
            vmem_limit_bytes=vmem_limit,
        ),
    )(*args)

    return out.reshape(orig_shape)


def _ref_layer_norm(x, weight, bias):
    xf = x.astype(jnp.float32)
    mean = jnp.mean(xf, axis=-1, keepdims=True)
    var = jnp.mean((xf - mean) ** 2, axis=-1, keepdims=True)
    y = (xf - mean) * jax.lax.rsqrt(var + _EPS) * weight.astype(jnp.float32)
    if bias is not None:
        y = y + bias.astype(jnp.float32)
    return y


if __name__ == "__main__":
    key = jax.random.PRNGKey(0)
    B, T, C = 2, 8, 32  # batch, seq, hidden (small test shape)

    x = jax.random.normal(key, (B, T, C), dtype=jnp.float32)

    # Deterministic parameter init matching nn.Parameter(torch.ones/zeros(ndim)).
    weight = jnp.ones((C,), dtype=jnp.float32)
    bias = jnp.zeros((C,), dtype=jnp.float32)

    # With bias (default one-pass moments).
    y = jax.block_until_ready(layer_norm(x, weight, bias))
    ref = _ref_layer_norm(x, weight, bias).astype(x.dtype)
    assert jnp.allclose(y, ref, atol=1e-5, rtol=1e-5), "mismatch vs reference (bias)"

    # Two-pass fallback path (numerically safest variant).
    y_tp = jax.block_until_ready(layer_norm(x, weight, bias, two_pass=True))
    assert jnp.allclose(y_tp, ref, atol=1e-5, rtol=1e-5), "mismatch vs reference (two-pass)"

    # Without bias (bias=None path: no zeros tensor, no bias stream/add).
    y_nb = jax.block_until_ready(layer_norm(x, weight, None))
    ref_nb = _ref_layer_norm(x, weight, None).astype(x.dtype)
    assert jnp.allclose(y_nb, ref_nb, atol=1e-5, rtol=1e-5), "mismatch vs reference (no bias)"

    # Non-divisible row count: exercises the single full-row boundary block.
    x_odd = jax.random.normal(jax.random.PRNGKey(1), (3, 5, C), dtype=jnp.float32)
    y_odd = jax.block_until_ready(layer_norm(x_odd, weight, bias))
    ref_odd = _ref_layer_norm(x_odd, weight, bias).astype(x_odd.dtype)
    assert jnp.allclose(y_odd, ref_odd, atol=1e-5, rtol=1e-5), "mismatch vs reference (odd rows)"

    # Multi-step grid with lane-dense C (multiple of 128) — exercises the
    # >=8-step / even-step tiling and the parallel 1-D grid.
    C2 = 128
    x_big = jax.random.normal(jax.random.PRNGKey(2), (4, 256, C2), dtype=jnp.float32)
    w_big = jax.random.normal(jax.random.PRNGKey(3), (C2,), dtype=jnp.float32) * 0.1 + 1.0
    b_big = jax.random.normal(jax.random.PRNGKey(4), (C2,), dtype=jnp.float32) * 0.1
    y_big = jax.block_until_ready(layer_norm(x_big, w_big, b_big))
    ref_big = _ref_layer_norm(x_big, w_big, b_big).astype(x_big.dtype)
    assert jnp.allclose(y_big, ref_big, atol=1e-5, rtol=1e-5), "mismatch vs reference (big)"

    # bf16 I/O path: dtype-aware tile sizing, f32 accumulation inside.
    x_bf = x.astype(jnp.bfloat16)
    y_bf = jax.block_until_ready(layer_norm(x_bf, weight, bias))
    ref_bf = _ref_layer_norm(x_bf, weight, bias)  # f32 reference
    assert jnp.allclose(y_bf.astype(jnp.float32), ref_bf, atol=3e-2, rtol=3e-2), \
        "mismatch vs reference (bf16)"

    print("KERNEL_OK")
</pallas_src>

<mosaic_0001>
module attributes {stable_mosaic.version = 11 : i64} {
  func.func @kernel(%arg0: i32, %arg1: memref<16x32xf32, #tpu.memory_space<vmem>>, %arg2: memref<1x32xf32, #tpu.memory_space<vmem>>, %arg3: memref<1x32xf32, #tpu.memory_space<vmem>>, %arg4: memref<16x32xf32, #tpu.memory_space<vmem>>) attributes {dimension_semantics = [#tpu.dimension_semantics<parallel>], iteration_bounds = array<i64: 1>, scalar_prefetch = 0 : i64, scratch_operands = 0 : i64, tpu.core_type = #tpu.core_type<tc>, window_params = [{transform_indices = @transform_0, window_bounds = array<i64: 16, 32>}, {pipeline_mode = #tpu.pipeline_mode<synchronous>, transform_indices = @transform_1, window_bounds = array<i64: 1, 32>}, {pipeline_mode = #tpu.pipeline_mode<synchronous>, transform_indices = @transform_2, window_bounds = array<i64: 1, 32>}, {transform_indices = @transform_3, window_bounds = array<i64: 16, 32>}]} {
    %c0 = arith.constant 0 : index
    %c0_0 = arith.constant 0 : index
    %0 = vector.load %arg1[%c0, %c0_0] : memref<16x32xf32, #tpu.memory_space<vmem>>, vector<16x32xf32>
    %cst = arith.constant dense<0.000000e+00> : vector<16xf32>
    %1 = vector.multi_reduction <add>, %0, %cst [1] : vector<16x32xf32> to vector<16xf32>
    %2 = vector.shape_cast %1 : vector<16xf32> to vector<16x1xf32>
    %cst_1 = arith.constant 3.200000e+01 : f32
    %3 = vector.broadcast %cst_1 : f32 to vector<16x1xf32>
    %4 = arith.divf %2, %3 : vector<16x1xf32>
    %5 = arith.mulf %0, %0 : vector<16x32xf32>
    %cst_2 = arith.constant dense<0.000000e+00> : vector<16xf32>
    %6 = vector.multi_reduction <add>, %5, %cst_2 [1] : vector<16x32xf32> to vector<16xf32>
    %7 = vector.shape_cast %6 : vector<16xf32> to vector<16x1xf32>
    %cst_3 = arith.constant 3.200000e+01 : f32
    %8 = vector.broadcast %cst_3 : f32 to vector<16x1xf32>
    %9 = arith.divf %7, %8 : vector<16x1xf32>
    %10 = arith.mulf %4, %4 : vector<16x1xf32>
    %11 = arith.subf %9, %10 : vector<16x1xf32>
    %cst_4 = arith.constant 0.000000e+00 : f32
    %12 = vector.broadcast %cst_4 : f32 to vector<16x1xf32>
    %13 = arith.maximumf %11, %12 : vector<16x1xf32>
    %14 = vector.broadcast %4 : vector<16x1xf32> to vector<16x32xf32>
    %15 = arith.subf %0, %14 : vector<16x32xf32>
    %cst_5 = arith.constant 9.99999974E-6 : f32
    %16 = vector.broadcast %cst_5 : f32 to vector<16x1xf32>
    %17 = arith.addf %13, %16 : vector<16x1xf32>
    %18 = math.rsqrt %17 : vector<16x1xf32>
    %19 = vector.broadcast %18 : vector<16x1xf32> to vector<16x32xf32>
    %20 = arith.mulf %15, %19 : vector<16x32xf32>
    %c0_6 = arith.constant 0 : index
    %c0_7 = arith.constant 0 : index
    %21 = vector.load %arg2[%c0_6, %c0_7] : memref<1x32xf32, #tpu.memory_space<vmem>>, vector<1x32xf32>
    %22 = vector.broadcast %21 : vector<1x32xf32> to vector<16x32xf32>
    %23 = arith.mulf %20, %22 : vector<16x32xf32>
    %c0_8 = arith.constant 0 : index
    %c0_9 = arith.constant 0 : index
    %24 = vector.load %arg3[%c0_8, %c0_9] : memref<1x32xf32, #tpu.memory_space<vmem>>, vector<1x32xf32>
    %25 = vector.broadcast %24 : vector<1x32xf32> to vector<16x32xf32>
    %26 = arith.addf %23, %25 : vector<16x32xf32>
    %c0_10 = arith.constant 0 : index
    %c0_11 = arith.constant 0 : index
    %27 = vector.load %arg4[%c0_10, %c0_11] : memref<16x32xf32, #tpu.memory_space<vmem>>, vector<16x32xf32>
    tpu.vector_store %arg4[%c0_10, %c0_11], %26 {strides = array<i32>} : memref<16x32xf32, #tpu.memory_space<vmem>>, vector<16x32xf32>,
    return
  }
  func.func @transform_0(%arg0: i32) -> (i32, i32) {
    %c0_i32 = arith.constant 0 : i32
    %c0_i32_0 = arith.constant 0 : i32
    return %arg0, %c0_i32 : i32, i32
  }
  func.func @transform_1(%arg0: i32) -> (i32, i32) {
    %c0_i32 = arith.constant 0 : i32
    %c0_i32_0 = arith.constant 0 : i32
    %c0_i32_1 = arith.constant 0 : i32
    return %c0_i32, %c0_i32_0 : i32, i32
  }
  func.func @transform_2(%arg0: i32) -> (i32, i32) {
    %c0_i32 = arith.constant 0 : i32
    %c0_i32_0 = arith.constant 0 : i32
    %c0_i32_1 = arith.constant 0 : i32
    return %c0_i32, %c0_i32_0 : i32, i32
  }
  func.func @transform_3(%arg0: i32) -> (i32, i32) {
    %c0_i32 = arith.constant 0 : i32
    %c0_i32_0 = arith.constant 0 : i32
    return %arg0, %c0_i32 : i32, i32
  }
}

</mosaic_0001>

<bundles_post_ra>
// kernel: tpu_custom_call.1
= control target key start
LH: loop header
LB: loop body
LE: loop exit
PB: predicated region body
PF: predicated region fallthrough
CT: control target
= control target key end

     0   :  { %8 = vsyncpa [#allocation3], 0  ;;  %s226_s0 = inlined_call_operand.hbm [shape: f32[16,32], index: 0, kind: input, shape index: {}]   ;;  %s227_s1 = inlined_call_operand.vmem [shape: f32[1,32], index: 1, kind: input, shape index: {}]   ;;  %s228_s2 = inlined_call_operand.vmem [shape: f32[1,32], index: 2, kind: input, shape index: {}]   ;;  %s229_s3 = inlined_call_operand.hbm [shape: f32[16,32], index: 3, kind: output, shape index: {}]  }
   0x1   :  { %9 = vsyncpa [#allocation4], 0  ;;  %s160_s12 = smov [#allocation2]   ;;  %s112_s16 = scalar_lea.hbm %s226_s0, 256 }
   0x2   :  { %s15_s13 = sshll.u32 %s160_s12, 4  ;;  %p113_p0 = scmp.ne.s32.totalorder %s226_s0, %s112_s16  ;;  %s16_s13 = int_to_ptr.vmem [resolvable:$true] %s15_s13 }
   0x3   :  { %p116_p1 = scmp.lt.u32.totalorder %s112_s16, %s226_s0 }
   0x5   :  { %p118_p2 = pnand %p116_p1, %p113_p0 }
   0x7   :  { %121 = shalt.err (!%p118_p2)
}
   0x8   :  { %s122_s21 = scalar_lea.vmem %s16_s13, 256  ;;  %p127_p4 = scmp.lt.s32.totalorder %s16_s13, %s16_s13 }
   0x9   :  { %p123_p3 = scmp.ne.s32.totalorder %s16_s13, %s122_s21  ;;  %p128_p5 = scmp.lt.s32.totalorder %s122_s21, %s122_s21 }
   0xb   :  { %p129_p6 = por %p128_p5, %p127_p4 }
   0xd   :  { %p130_p7 = pnand %p129_p6, %p123_p3 }
   0xf   :  { %133 = shalt.err (!%p130_p7)
}
  0x10   :  { %s161_s22 = smov 128   ;;  %s162_s23 = smov 8  }
  0x11   :  { %21 = dma.hbm_to_vmem [thread:$0]  %s226_s0, 256, %s16_s13, [#allocation3], %s161_s22, %s161_s22, %s162_s23  }
  0x12   :  { %156 = dma.done.wait [#allocation3], 256  }
  0x13   :  { %157 = vsyncadd [#allocation3], 4294967040  ;;  %vm31_vm0 = vcmask 261120   ;;  %v29_v0 = vld [vmem:[#allocation2] sm:$0xff]  ;;  %v30_v1 = vld [vmem:[#allocation2 + $0x8] sm:$0xff]  ;;  %s163_s29 = smov [#allocation5]  }
  0x14   :  { %v32_v2 = vsel %vm31_vm0, %v29_v0, 0.0  ;;  %v41_v3 = vmul.f32 %v29_v0, %v29_v0  ;;  %v42_v4 = vmul.f32 %v30_v1, %v30_v1  ;;  %v35_v6 = vsel %vm31_vm0, %v30_v1, 0.0  ;;  %v102_v26 = vld [vmem:[%s227_s1] ss:$0 sm:$0xff]  ;;  %s90_s30 = sshll.u32 %s163_s29, 4  ;;  %s91_s30 = int_to_ptr.vmem [resolvable:$true] %s90_s30 }
  0x15   :  { %33 = vadd.xlane.f32.xlu0 %v32_v2  ;;  %v103_v28 = vld [vmem:[%s228_s2] ss:$0 sm:$0xff]  ;;  %s134_s1 = scalar_lea.vmem %s91_s30, 256  ;;  %p139_p9 = scmp.lt.s32.totalorder %s91_s30, %s91_s30 }
  0x16   :  { %v43_v5 = vsel %vm31_vm0, %v41_v3, 0.0  ;;  %v46_v7 = vsel %vm31_vm0, %v42_v4, 0.0  ;;  %p135_p8 = scmp.ne.s32.totalorder %s91_s30, %s134_s1  ;;  %p140_p10 = scmp.lt.s32.totalorder %s134_s1, %s134_s1 }
  0x17   :  { %44 = vadd.xlane.f32.xlu1 %v43_v5 }
  0x18   :  { %p141_p11 = por %p140_p10, %p139_p9 }
  0x19   :  { %36 = vadd.xlane.f32.xlu0 %v35_v6 }
  0x1a   :  { %p142_p12 = pnand %p141_p11, %p135_p8 }
  0x1b   :  { %47 = vadd.xlane.f32.xlu1 %v46_v7 }
  0xa2   :  { %v34_v8 = vpop.xlane.xlu0 %33 }
  0xa3   :  { %v39_v9 = vmul.f32 0.03125, %v34_v8 }
  0xa4   :  { %v45_v10 = vpop.xlane.xlu1 %44 }
  0xa5   :  { %v51_v11 = vmul.f32 %v39_v9, %v39_v9  ;;  %v49_v12 = vmul.f32 0.03125, %v45_v10  ;;  %v57_v24 = vsub.f32 %v29_v0, %v39_v9 }
  0xa6   :  { %v37_v13 = vpop.xlane.xlu0 %36 }
  0xa7   :  { %v53_v14 = vsub.f32 %v49_v12, %v51_v11  ;;  %v40_v15 = vmul.f32 0.03125, %v37_v13 }
  0xa8   :  { %v48_v16 = vpop.xlane.xlu1 %47 }
  0xa9   :  { %v55_v17 = vmax.f32 %v53_v14, 0.0  ;;  %v52_v18 = vmul.f32 %v40_v15, %v40_v15  ;;  %v50_v19 = vmul.f32 0.03125, %v48_v16  ;;  %v58_v29 = vsub.f32 %v30_v1, %v40_v15 }
  0xab   :  { %v59_v20 = vadd.f32 1e-05, %v55_v17  ;;  %v54_v21 = vsub.f32 %v50_v19, %v52_v18 }
  0xad   :  { %108 = vrsqrt.f32 %v59_v20  ;;  %v56_v22 = vmax.f32 %v54_v21, 0.0 }
  0xaf   :  { %v60_v23 = vadd.f32 1e-05, %v56_v22 }
  0xb1   :  { %110 = vrsqrt.f32 %v60_v23 }
  0xb7   :  { %v109_v25 = vpop.eup %108 }
  0xb8   :  { %v63_v27 = vmul.f32 %v109_v25, %v57_v24 }
  0xba   :  { %v72_v30 = vmul.f32 %v102_v26, %v63_v27 }
  0xbb   :  { %v111_v31 = vpop.eup %110 }
  0xbc   :  { %v64_v32 = vmul.f32 %v111_v31, %v58_v29  ;;  %v81_v33 = vadd.f32 %v103_v28, %v72_v30 }
  0xbe   :  { %v73_v34 = vmul.f32 %v102_v26, %v64_v32  ;;  %83 = vst.msk [vmem:[#allocation5] sm:$0xff] %vm31_vm0, %v81_v33 }
  0xc0   :  { %v82_v35 = vadd.f32 %v103_v28, %v73_v34 }
  0xc2   :  { %84 = vst.msk [vmem:[#allocation5 + $0x8] sm:$0xff] %vm31_vm0, %v82_v35 }
  0xc3   :  { %145 = shalt.err (!%p142_p12)
}
  0xc4   :  { %s146_s5 = scalar_lea.hbm %s229_s3, 256 }
  0xc5   :  { %p147_p13 = scmp.ne.s32.totalorder %s229_s3, %s146_s5  ;;  %p150_p0 = scmp.lt.u32.totalorder %s146_s5, %s229_s3 }
  0xc7   :  { %p152_p1 = pnand %p150_p0, %p147_p13 }
  0xc9   :  { %155 = shalt.err (!%p152_p1)
}
  0xca   :  { %96 = dma.vmem_to_hbm [thread:$0]  %s91_s30, 256, %s229_s3, [#allocation4], %s161_s22, %s161_s22, %s162_s23  }
  0xcb   :  { %158 = dma.done.wait [#allocation4], 256  }
  0xcc   :  { %159 = vsyncadd [#allocation4], 4294967040 }
  0xcd   :  { %100 = vsyncpa [#allocation3], 1 }
  0xce   :  { %101 = vsyncpa [#allocation4], 1 }

</bundles_post_ra>
